<compile_context>
chip_gen: v7x
topology: tpu7x:2x2x1
jax: 0.10.0
libtpu: 0.0.40
codegen_flags: <defaults>
</compile_context>

<pallas_src>
import functools

import jax
import jax.numpy as jnp
from jax.experimental import pallas as pl
from jax.experimental.pallas import tpu as pltpu


def _cdiv(a: int, b: int) -> int:
    return -(-a // b)


def _min_max_scale_kernel(x_ref, o_ref, *, scale: float, offset: float,
                          compute_dtype):
    # Single fused multiply-add on the VPU. scale/offset are static Python
    # floats -> folded to immediates (no captured device constants).
    x = x_ref[...]
    if compute_dtype is not None and x.dtype != compute_dtype:
        x = x.astype(compute_dtype)
    o_ref[...] = (x * scale + offset).astype(o_ref.dtype)


def _generation_config():
    """Per-generation tiling / VMEM budget (see header comment)."""
    kind = ""
    try:
        kind = jax.devices()[0].device_kind.lower()
    except Exception:
        pass
    if "v5e" in kind or "v5 lite" in kind or "v5lite" in kind:
        return dict(tile_bytes=4 << 20, vmem_limit=64 << 20, min_steps=3,
                    cores=1, native_half=False)
    if "v6" in kind:
        return dict(tile_bytes=8 << 20, vmem_limit=64 << 20, min_steps=3,
                    cores=1, native_half=True)
    if "v7" in kind or "7x" in kind:
        return dict(tile_bytes=8 << 20, vmem_limit=48 << 20, min_steps=8,
                    cores=2, native_half=True)
    # Unknown generation: conservative budget (fits even a 16 MiB scoped
    # default, though we still set the limit explicitly).
    return dict(tile_bytes=4 << 20, vmem_limit=32 << 20, min_steps=3,
                cores=1, native_half=False)


def _pick_tile_rows(rows: int, sub: int, target_rows: int, min_steps: int,
                    prefer_even_steps: bool) -> int:
    """Largest tile_rows (multiple of `sub`, <= target) that divides `rows`.

    Enforces at least `min_steps` grid steps when the array is big enough so
    the pipeline has prefetch/writeback overlap (and, on dual-TC chips, both
    cores get balanced work). Prefers an even step count on dual-TC chips.
    Falls back to a non-divisor (masked partial last block) if needed.
    """
    cap = max(sub, (min(target_rows, rows) // sub) * sub)
    if rows >= min_steps * sub:
        cap = min(cap, max(sub, (rows // min_steps) // sub * sub))

    best = None
    best_even = None
    for cand in range(cap, sub - 1, -sub):
        if rows % cand == 0:
            if best is None:
                best = cand
            if (rows // cand) % 2 == 0:
                best_even = cand
                break
            if not prefer_even_steps:
                break
    if prefer_even_steps and best_even is not None and 2 * best_even >= best:
        return best_even
    if best is not None:
        return best
    return cap  # no exact divisor: Pallas masks the partial last block


def _choose_layout(n: int, itemsize: int, cfg):
    """Pick (rows, lane, tile_rows) for a copy-free lane-dense 2D view.

    Returns None when n is not a multiple of 128 (ragged) -> caller falls back
    to plain jnp (still a single fused FMA, and avoids any padding copies).
    """
    lane = None
    for cand in (4096, 2048, 1024, 512, 256, 128):
        if n % cand == 0:
            lane = cand
            break
    if lane is None:
        return None
    rows = n // lane

    # Sublane packing multiple: 8 for f32, 16 for bf16/f16, 32 for int8/fp8.
    sub = max(8, 32 // itemsize)
    if rows <= sub:
        # Single block covering the full (tiny) array; full-extent dims are
        # exempt from the (8, 128) divisibility rule.
        return rows, lane, rows

    target_rows = max(sub, (cfg["tile_bytes"] // (lane * itemsize)) // sub * sub)
    tile_rows = _pick_tile_rows(rows, sub, target_rows, cfg["min_steps"],
                                cfg["cores"] > 1)
    return rows, lane, tile_rows


def min_max_scale(
    x,
    minimum_value: float,
    maximum_value: float,
    interval_min: float = -1.0,
    interval_max: float = 1.0,
    *,
    small_input_bytes: int = 1 << 18,  # below ~256 KiB, plain XLA FMA wins
    force_pallas: bool = False,
    in_place: bool = False,           # donate x's buffer to the output
):
    """MinMaxScaler.forward for `x` of any shape via a Pallas TPU kernel."""
    if maximum_value == minimum_value:
        raise ValueError("maximum_value must differ from minimum_value")

    orig_shape = x.shape
    dtype = jnp.dtype(x.dtype)
    itemsize = dtype.itemsize
    n = x.size

    # Fold to y = x * scale + offset (same affine map as the reference).
    scale = (interval_max - interval_min) / (maximum_value - minimum_value)
    offset = interval_min - minimum_value * scale

    # Output dtype: float inputs keep their dtype; integer inputs promote to
    # f32 (matches PyTorch's int-tensor * python-float promotion).
    if jnp.issubdtype(dtype, jnp.floating):
        out_dtype = dtype
    else:
        out_dtype = jnp.dtype(jnp.float32)

    cfg = _generation_config()
    layout = _choose_layout(n, itemsize, cfg)
    use_pallas = layout is not None and (
        force_pallas or n * itemsize >= small_input_bytes
    )
    if not use_pallas:
        # Small or ragged inputs: a single fused FMA in XLA; no launch
        # overhead, no padding copies.
        return (x * scale + offset).astype(out_dtype)

    # Compute dtype inside the kernel: bf16/f16 stay native on chips with a
    # bf16 VALU (v6e/v7x) -> half the vreg footprint; upcast to f32 otherwise.
    if dtype == jnp.bfloat16 or dtype == jnp.float16:
        compute_dtype = None if cfg["native_half"] else jnp.float32
    elif jnp.issubdtype(dtype, jnp.floating):
        compute_dtype = None
    else:
        compute_dtype = jnp.float32

    rows, lane, tile_rows = layout
    x2d = jnp.reshape(x, (rows, lane))  # free reshape, no data movement
    grid = (_cdiv(rows, tile_rows),)

    kernel = functools.partial(
        _min_max_scale_kernel,
        scale=float(scale), offset=float(offset), compute_dtype=compute_dtype,
    )

    aliases = {0: 0} if (in_place and out_dtype == dtype) else {}

    y2d = pl.pallas_call(
        kernel,
        out_shape=jax.ShapeDtypeStruct((rows, lane), out_dtype),
        grid_spec=pltpu.PrefetchScalarGridSpec(
            num_scalar_prefetch=0,
            grid=grid,
            in_specs=[pl.BlockSpec((tile_rows, lane), lambda i: (i, 0))],
            out_specs=pl.BlockSpec((tile_rows, lane), lambda i: (i, 0)),
        ),
        compiler_params=pltpu.CompilerParams(
            dimension_semantics=("parallel",),
            vmem_limit_bytes=cfg["vmem_limit"],
        ),
        cost_estimate=pl.CostEstimate(
            flops=2 * n,
            transcendentals=0,
            bytes_accessed=n * itemsize + n * out_dtype.itemsize,
        ),
        input_output_aliases=aliases,
    )(x2d)

    return jnp.reshape(y2d, orig_shape)


def min_max_scale_ref(x, minimum_value, maximum_value, interval_min, interval_max):
    return (x - minimum_value) / (maximum_value - minimum_value) * (
        interval_max - interval_min
    ) + interval_min


if __name__ == "__main__":
    minimum_value = 0.0
    maximum_value = 255.0
    interval_min = -1.0
    interval_max = 1.0

    key = jax.random.PRNGKey(0)
    k1, k2, k3 = jax.random.split(key, 3)

    # Small image-like input (NCHW) consistent with typical diffusion usage.
    x = jax.random.uniform(
        k1, (2, 4, 16, 16), dtype=jnp.float32, minval=0.0, maxval=255.0
    )
    # Force the Pallas path on the small demo shape to exercise the kernel.
    y = min_max_scale(
        x, minimum_value, maximum_value, interval_min, interval_max,
        force_pallas=True,
    )
    y = jax.block_until_ready(y)
    y_ref = min_max_scale_ref(x, minimum_value, maximum_value,
                              interval_min, interval_max)
    assert y.shape == x.shape and y.dtype == x.dtype
    assert jnp.allclose(y, y_ref, atol=1e-5, rtol=1e-5)

    # Larger f32 input: hits the Pallas path by default with a multi-step,
    # full-block (unmasked-store) grid.
    x_large = jax.random.uniform(
        k2, (2, 4, 128, 256), dtype=jnp.float32, minval=0.0, maxval=255.0
    )
    y_large = min_max_scale(
        x_large, minimum_value, maximum_value, interval_min, interval_max
    )
    y_large = jax.block_until_ready(y_large)
    y_large_ref = min_max_scale_ref(
        x_large, minimum_value, maximum_value, interval_min, interval_max
    )
    assert y_large.shape == x_large.shape and y_large.dtype == x_large.dtype
    assert jnp.allclose(y_large, y_large_ref, atol=1e-5, rtol=1e-5)

    # bf16 input: exercises the native-half path on v6e/v7x (f32 upcast on v5e).
    x_bf16 = jax.random.uniform(
        k3, (2, 4, 128, 128), dtype=jnp.float32, minval=0.0, maxval=255.0
    ).astype(jnp.bfloat16)
    y_bf16 = min_max_scale(
        x_bf16, minimum_value, maximum_value, interval_min, interval_max,
        force_pallas=True,
    )
    y_bf16 = jax.block_until_ready(y_bf16)
    y_bf16_ref = min_max_scale_ref(
        x_bf16.astype(jnp.float32), minimum_value, maximum_value,
        interval_min, interval_max,
    )
    assert y_bf16.shape == x_bf16.shape and y_bf16.dtype == jnp.bfloat16
    assert jnp.allclose(y_bf16.astype(jnp.float32), y_bf16_ref,
                        atol=2e-2, rtol=2e-2)

    print("KERNEL_OK")
</pallas_src>

<mosaic_0001>
module attributes {stable_mosaic.version = 11 : i64} {
  func.func @_min_max_scale_kernel(%arg0: i32, %arg1: memref<1x2048xf32, #tpu.memory_space<vmem>>, %arg2: memref<1x2048xf32, #tpu.memory_space<vmem>>) attributes {dimension_semantics = [#tpu.dimension_semantics<parallel>], iteration_bounds = array<i64: 1>, scalar_prefetch = 0 : i64, scratch_operands = 0 : i64, tpu.core_type = #tpu.core_type<tc>, window_params = [{transform_indices = @transform_0, window_bounds = array<i64: 1, 2048>}, {transform_indices = @transform_1, window_bounds = array<i64: 1, 2048>}]} {
    %c0 = arith.constant 0 : index
    %c0_0 = arith.constant 0 : index
    %0 = vector.load %arg1[%c0, %c0_0] : memref<1x2048xf32, #tpu.memory_space<vmem>>, vector<1x2048xf32>
    %cst = arith.constant 0.00784313772 : f32
    %1 = vector.broadcast %cst : f32 to vector<1x2048xf32>
    %2 = arith.mulf %0, %1 : vector<1x2048xf32>
    %cst_1 = arith.constant -1.000000e+00 : f32
    %3 = vector.broadcast %cst_1 : f32 to vector<1x2048xf32>
    %4 = arith.addf %2, %3 : vector<1x2048xf32>
    %c0_2 = arith.constant 0 : index
    %c0_3 = arith.constant 0 : index
    %5 = vector.load %arg2[%c0_2, %c0_3] : memref<1x2048xf32, #tpu.memory_space<vmem>>, vector<1x2048xf32>
    tpu.vector_store %arg2[%c0_2, %c0_3], %4 {strides = array<i32>} : memref<1x2048xf32, #tpu.memory_space<vmem>>, vector<1x2048xf32>,
    return
  }
  func.func @transform_0(%arg0: i32) -> (i32, i32) {
    %c0_i32 = arith.constant 0 : i32
    %c0_i32_0 = arith.constant 0 : i32
    return %arg0, %c0_i32 : i32, i32
  }
  func.func @transform_1(%arg0: i32) -> (i32, i32) {
    %c0_i32 = arith.constant 0 : i32
    %c0_i32_0 = arith.constant 0 : i32
    return %arg0, %c0_i32 : i32, i32
  }
}

</mosaic_0001>

<bundles_post_ra>
// kernel: tpu_custom_call.1
= control target key start
LH: loop header
LB: loop body
LE: loop exit
PB: predicated region body
PF: predicated region fallthrough
CT: control target
= control target key end

     0   :  { %6 = vsyncpa [#allocation3], 0  ;;  %s130_s0 = inlined_call_operand.hbm [shape: f32[1,2048], index: 0, kind: input, shape index: {}]   ;;  %s131_s1 = inlined_call_operand.hbm [shape: f32[1,2048], index: 1, kind: output, shape index: {}]  }
   0x1   :  { %7 = vsyncpa [#allocation4], 0  ;;  %s94_s6 = smov [#allocation2]   ;;  %s46_s10 = scalar_lea.hbm %s130_s0, 256 }
   0x2   :  { %s14_s7 = sshll.u32 %s94_s6, 4  ;;  %p47_p0 = scmp.ne.s32.totalorder %s130_s0, %s46_s10  ;;  %s15_s7 = int_to_ptr.vmem [resolvable:$true] %s14_s7 }
   0x3   :  { %p50_p1 = scmp.lt.u32.totalorder %s46_s10, %s130_s0 }
   0x5   :  { %p52_p2 = pnand %p50_p1, %p47_p0 }
   0x7   :  { %55 = shalt.err (!%p52_p2)
}
   0x8   :  { %s56_s15 = scalar_lea.vmem %s15_s7, 256  ;;  %p61_p4 = scmp.lt.s32.totalorder %s15_s7, %s15_s7 }
   0x9   :  { %p57_p3 = scmp.ne.s32.totalorder %s15_s7, %s56_s15  ;;  %p62_p5 = scmp.lt.s32.totalorder %s56_s15, %s56_s15 }
   0xb   :  { %p63_p6 = por %p62_p5, %p61_p4 }
   0xd   :  { %p64_p7 = pnand %p63_p6, %p57_p3 }
   0xf   :  { %67 = shalt.err (!%p64_p7)
}
  0x10   :  { %17 = dma.hbm_to_vmem [thread:$0]  %s130_s0, 256, %s15_s7, [#allocation3]  }
  0x11   :  { %90 = dma.done.wait [#allocation3], 256  }
  0x12   :  { %91 = vsyncadd [#allocation3], 4294967040  ;;  %v21_v0 = vld [vmem:[#allocation2] sm:$0xff]  ;;  %v22_v1 = vld [vmem:[#allocation2 + $0x8] sm:$0xff]  ;;  %s95_s18 = smov [#allocation5]  }
  0x13   :  { %s35_s19 = sshll.u32 %s95_s18, 4  ;;  %v23_v2 = vmul.f32 0.007843138, %v21_v0  ;;  %v24_v3 = vmul.f32 0.007843138, %v22_v1  ;;  %s36_s19 = int_to_ptr.vmem [resolvable:$true] %s35_s19 }
  0x14   :  { %s68_s20 = scalar_lea.vmem %s36_s19, 256  ;;  %p73_p9 = scmp.lt.s32.totalorder %s36_s19, %s36_s19 }
  0x15   :  { %v25_v4 = vadd.f32 -1.0, %v23_v2  ;;  %v26_v5 = vadd.f32 -1.0, %v24_v3  ;;  %p69_p8 = scmp.ne.s32.totalorder %s36_s19, %s68_s20  ;;  %p74_p10 = scmp.lt.s32.totalorder %s68_s20, %s68_s20 }
  0x17   :  { %27 = vst [vmem:[#allocation5] sm:$0xff] %v25_v4  ;;  %28 = vst [vmem:[#allocation5 + $0x8] sm:$0xff] %v26_v5  ;;  %p75_p11 = por %p74_p10, %p73_p9 }
  0x19   :  { %p76_p12 = pnand %p75_p11, %p69_p8 }
  0x1b   :  { %79 = shalt.err (!%p76_p12)
}
  0x1c   :  { %s80_s22 = scalar_lea.hbm %s131_s1, 256 }
  0x1d   :  { %p81_p13 = scmp.ne.s32.totalorder %s131_s1, %s80_s22  ;;  %p84_p0 = scmp.lt.u32.totalorder %s80_s22, %s131_s1 }
  0x1f   :  { %p86_p1 = pnand %p84_p0, %p81_p13 }
  0x21   :  { %89 = shalt.err (!%p86_p1)
}
  0x22   :  { %38 = dma.vmem_to_hbm [thread:$0]  %s36_s19, 256, %s131_s1, [#allocation4]  }
  0x23   :  { %92 = dma.done.wait [#allocation4], 256  }
  0x24   :  { %93 = vsyncadd [#allocation4], 4294967040 }
  0x25   :  { %42 = vsyncpa [#allocation3], 1 }
  0x26   :  { %43 = vsyncpa [#allocation4], 1 }

</bundles_post_ra>
